<compile_context>
chip_gen: v7x
topology: tpu7x:2x2x1
jax: 0.10.0
libtpu: 0.0.40
codegen_flags: <defaults>
</compile_context>

<pallas_src>
import functools
import math

import jax
import jax.numpy as jnp
from jax.experimental import pallas as pl
from jax.experimental.pallas import tpu as pltpu


# ---------------------------------------------------------------------------
# Tile-size helper: largest tile <= preferred that divides `dim` and is a
# multiple of `align` (falls back to the full dim, which always satisfies the
# TPU (8,128) block-layout rule).
# ---------------------------------------------------------------------------
def _pick_tile(dim, preferred, align):
    if dim <= preferred:
        return dim
    t = (preferred // align) * align
    while t >= align:
        if dim % t == 0:
            return t
        t -= align
    return dim


_VMEM_LIMIT = 32 * 1024 * 1024  # fits v5e/v6e/v7x; tiles below stay well under


# ---------------------------------------------------------------------------
# Fused Q/K/V projection:  q = x@Wq, k = x@Wk, v = x@Wv   (weights pre-(K,N))
# grid = (M//tm, K//tk); x is read from HBM once for all three matmuls.
# ---------------------------------------------------------------------------
def _qkv_proj_kernel(x_ref, wq_ref, wk_ref, wv_ref, q_ref, k_ref, v_ref,
                     accq_ref, acck_ref, accv_ref):
    kk = pl.program_id(1)

    @pl.when(kk == 0)
    def _init():
        accq_ref[...] = jnp.zeros_like(accq_ref)
        acck_ref[...] = jnp.zeros_like(acck_ref)
        accv_ref[...] = jnp.zeros_like(accv_ref)

    x = x_ref[...]
    accq_ref[...] += jnp.dot(x, wq_ref[...], preferred_element_type=jnp.float32)
    acck_ref[...] += jnp.dot(x, wk_ref[...], preferred_element_type=jnp.float32)
    accv_ref[...] += jnp.dot(x, wv_ref[...], preferred_element_type=jnp.float32)

    @pl.when(kk == pl.num_programs(1) - 1)
    def _finalize():
        q_ref[...] = accq_ref[...].astype(q_ref.dtype)
        k_ref[...] = acck_ref[...].astype(k_ref.dtype)
        v_ref[...] = accv_ref[...].astype(v_ref.dtype)


def pallas_qkv_proj(x2d, wq_t, wk_t, wv_t, *, tm=256, tk=512):
    """x2d: (M, K); wq_t/wk_t/wv_t: (K, Hq)/(K, Hkv)/(K, Hkv)."""
    M, K = x2d.shape
    Hq = wq_t.shape[1]
    Hkv = wk_t.shape[1]
    tm = _pick_tile(M, tm, 8)
    tk = _pick_tile(K, tk, 128)
    grid = (M // tm, K // tk)

    return pl.pallas_call(
        _qkv_proj_kernel,
        out_shape=(jax.ShapeDtypeStruct((M, Hq), x2d.dtype),
                   jax.ShapeDtypeStruct((M, Hkv), x2d.dtype),
                   jax.ShapeDtypeStruct((M, Hkv), x2d.dtype)),
        grid=grid,
        in_specs=[
            pl.BlockSpec((tm, tk), lambda i, kk: (i, kk)),
            pl.BlockSpec((tk, Hq), lambda i, kk: (kk, 0)),
            pl.BlockSpec((tk, Hkv), lambda i, kk: (kk, 0)),
            pl.BlockSpec((tk, Hkv), lambda i, kk: (kk, 0)),
        ],
        out_specs=(
            pl.BlockSpec((tm, Hq), lambda i, kk: (i, 0)),
            pl.BlockSpec((tm, Hkv), lambda i, kk: (i, 0)),
            pl.BlockSpec((tm, Hkv), lambda i, kk: (i, 0)),
        ),
        scratch_shapes=[
            pltpu.VMEM((tm, Hq), jnp.float32),
            pltpu.VMEM((tm, Hkv), jnp.float32),
            pltpu.VMEM((tm, Hkv), jnp.float32),
        ],
        compiler_params=pltpu.CompilerParams(
            dimension_semantics=("parallel", "arbitrary"),
            vmem_limit_bytes=_VMEM_LIMIT),
    )(x2d, wq_t, wk_t, wv_t)


# ---------------------------------------------------------------------------
# Generic tiled linear:  y = x @ w   (w already (K, N));  grid (M, N, K-reduce)
# ---------------------------------------------------------------------------
def _linear_kernel(x_ref, w_ref, o_ref, acc_ref):
    @pl.when(pl.program_id(2) == 0)
    def _init():
        acc_ref[...] = jnp.zeros_like(acc_ref)

    acc_ref[...] += jnp.dot(x_ref[...], w_ref[...],
                            preferred_element_type=jnp.float32)

    @pl.when(pl.program_id(2) == pl.num_programs(2) - 1)
    def _finalize():
        o_ref[...] = acc_ref[...].astype(o_ref.dtype)


def pallas_linear(x2d, w, *, tm=256, tn=512, tk=512):
    M, K = x2d.shape
    K2, N = w.shape
    assert K == K2
    tm = _pick_tile(M, tm, 8)
    tn = _pick_tile(N, tn, 128)
    tk = _pick_tile(K, tk, 128)
    grid = (M // tm, N // tn, K // tk)

    return pl.pallas_call(
        _linear_kernel,
        out_shape=jax.ShapeDtypeStruct((M, N), x2d.dtype),
        grid=grid,
        in_specs=[
            pl.BlockSpec((tm, tk), lambda i, j, kk: (i, kk)),
            pl.BlockSpec((tk, tn), lambda i, j, kk: (kk, j)),
        ],
        out_specs=pl.BlockSpec((tm, tn), lambda i, j, kk: (i, j)),
        scratch_shapes=[pltpu.VMEM((tm, tn), jnp.float32)],
        compiler_params=pltpu.CompilerParams(
            dimension_semantics=("parallel", "parallel", "arbitrary"),
            vmem_limit_bytes=_VMEM_LIMIT),
    )(x2d, w)


# ---------------------------------------------------------------------------
# Flash attention (causal, GQA) over (B, S, H)-layout Q/K/V.
# grid = (B, q_blocks, kv_blocks); online softmax state in VMEM scratch.
# ---------------------------------------------------------------------------
def _flash_attention_kernel(q_ref, k_ref, v_ref, o_ref,
                            acc_ref, m_ref, l_ref, *,
                            num_heads, n_rep, head_dim, tq, tkv, scale):
    qi = pl.program_id(1)
    ki = pl.program_id(2)

    @pl.when(ki == 0)
    def _init():
        m_ref[...] = jnp.full_like(m_ref, -jnp.inf)
        l_ref[...] = jnp.zeros_like(l_ref)
        acc_ref[...] = jnp.zeros_like(acc_ref)

    # Causal block skip: KV blocks strictly above the diagonal contribute
    # nothing (FLOPs skipped here; their DMA is elided by the clamped index_map).
    @pl.when(ki * tkv < (qi + 1) * tq)
    def _compute():
        q = q_ref[...] * scale          # fold 1/sqrt(D) into Q (O(tq*H) mults)
        k = k_ref[...]
        v = v_ref[...]

        q_pos = qi * tq + jax.lax.broadcasted_iota(jnp.int32, (tq, tkv), 0)
        k_pos = ki * tkv + jax.lax.broadcasted_iota(jnp.int32, (tq, tkv), 1)
        causal = k_pos <= q_pos

        dnums_qk = (((1,), (1,)), ((), ()))   # contract head_dim, no .T needed
        for h in range(num_heads):
            g = h // n_rep                    # GQA: KV head for query head h
            qh = q[:, h * head_dim:(h + 1) * head_dim]        # (tq, D)
            kh = k[:, g * head_dim:(g + 1) * head_dim]        # (tkv, D)
            vh = v[:, g * head_dim:(g + 1) * head_dim]        # (tkv, D)

            s = jax.lax.dot_general(qh, kh, dnums_qk,
                                    preferred_element_type=jnp.float32)
            s = jnp.where(causal, s, -jnp.inf)                # (tq, tkv) f32

            m_prev = m_ref[:, h:h + 1]                        # (tq, 1)
            m_new = jnp.maximum(m_prev, jnp.max(s, axis=-1, keepdims=True))
            alpha = jnp.exp(m_prev - m_new)
            p = jnp.exp(s - m_new)                            # f32

            l_ref[:, h:h + 1] = (alpha * l_ref[:, h:h + 1]
                                 + jnp.sum(p, axis=-1, keepdims=True))
            acc_ref[h] = alpha * acc_ref[h] + jnp.dot(
                p.astype(v.dtype), vh, preferred_element_type=jnp.float32)
            m_ref[:, h:h + 1] = m_new

    @pl.when(ki == pl.num_programs(2) - 1)
    def _finalize():
        for h in range(num_heads):
            inv_l = pl.reciprocal(l_ref[:, h:h + 1], approx=False)  # (tq, 1)
            o_ref[:, h * head_dim:(h + 1) * head_dim] = (
                acc_ref[h] * inv_l).astype(o_ref.dtype)


def pallas_flash_attention(q, k, v, *, num_heads, num_kv_heads, tq=256, tkv=256):
    """q: (B, S, num_heads*D); k/v: (B, S, num_kv_heads*D) -> (B, S, num_heads*D)."""
    B, S, Hq = q.shape
    Hkv = k.shape[-1]
    head_dim = Hq // num_heads
    n_rep = num_heads // num_kv_heads
    scale = 1.0 / math.sqrt(head_dim)

    tq = _pick_tile(S, tq, 8)
    tkv = _pick_tile(S, tkv, 8)
    grid = (B, S // tq, S // tkv)

    def q_map(b, qi, ki):
        return (b, qi, 0)

    def kv_map(b, qi, ki):
        # Clamp to the last KV block intersecting the causal band of this q
        # block: consecutive identical block indices => Pallas skips the DMA.
        last_needed = ((qi + 1) * tq - 1) // tkv
        return (b, jnp.minimum(ki, last_needed), 0)

    kernel = functools.partial(
        _flash_attention_kernel,
        num_heads=num_heads, n_rep=n_rep, head_dim=head_dim,
        tq=tq, tkv=tkv, scale=scale)

    return pl.pallas_call(
        kernel,
        out_shape=jax.ShapeDtypeStruct((B, S, Hq), q.dtype),
        grid=grid,
        in_specs=[
            pl.BlockSpec((None, tq, Hq), q_map),     # Q: fetched once per q block
            pl.BlockSpec((None, tkv, Hkv), kv_map),  # K: shared by all heads
            pl.BlockSpec((None, tkv, Hkv), kv_map),  # V: shared by all heads
        ],
        out_specs=pl.BlockSpec((None, tq, Hq), q_map),  # lane-dense (B,S,H) slab
        scratch_shapes=[
            pltpu.VMEM((num_heads, tq, head_dim), jnp.float32),  # acc
            pltpu.VMEM((tq, num_heads), jnp.float32),            # running max m
            pltpu.VMEM((tq, num_heads), jnp.float32),            # running denom l
        ],
        compiler_params=pltpu.CompilerParams(
            dimension_semantics=("parallel", "parallel", "arbitrary"),
            vmem_limit_bytes=_VMEM_LIMIT),
    )(q, k, v)


# ---------------------------------------------------------------------------
# Module wrapper (forward pass of HelixmRNAAttention, eval mode, causal mask)
# ---------------------------------------------------------------------------
def helix_attention_forward(hidden_states, params, num_heads, num_kv_heads, *,
                            tq=256, tkv=256,
                            proj_tm=256, proj_tk=512,
                            lin_tm=256, lin_tn=512, lin_tk=512):
    B, S, H = hidden_states.shape
    head_dim = H // num_heads
    Hq = num_heads * head_dim
    Hkv = num_kv_heads * head_dim

    x2d = hidden_states.reshape(B * S, H)

    # Fused QKV projection: x is streamed from HBM once for all three matmuls.
    # nn.Linear stores (out, in); the kernels consume (in, out).  In a real
    # model the transposed weights would be stored once, not per call.
    q2d, k2d, v2d = pallas_qkv_proj(
        x2d, params["wq"].T, params["wk"].T, params["wv"].T,
        tm=proj_tm, tk=proj_tk)

    # Keep the (B, S, heads*head_dim) layout end-to-end: no HBM transposes,
    # GQA handled inside the attention kernel via per-head slices.
    q = q2d.reshape(B, S, Hq)
    k = k2d.reshape(B, S, Hkv)
    v = v2d.reshape(B, S, Hkv)

    attn = pallas_flash_attention(
        q, k, v, num_heads=num_heads, num_kv_heads=num_kv_heads,
        tq=tq, tkv=tkv)                                     # (B, S, Hq)

    out2d = pallas_linear(attn.reshape(B * S, Hq), params["wo"].T,
                          tm=lin_tm, tn=lin_tn, tk=lin_tk)
    return out2d.reshape(B, S, H)


# ---------------------------------------------------------------------------
# Pure-JAX reference (mirrors the PyTorch forward with the model's causal mask)
# ---------------------------------------------------------------------------
def reference_forward(hidden_states, params, num_heads, num_kv_heads):
    B, S, H = hidden_states.shape
    head_dim = H // num_heads
    n_rep = num_heads // num_kv_heads

    q = hidden_states @ params["wq"].T
    k = hidden_states @ params["wk"].T
    v = hidden_states @ params["wv"].T
    q = q.reshape(B, S, num_heads, head_dim).transpose(0, 2, 1, 3)
    k = k.reshape(B, S, num_kv_heads, head_dim).transpose(0, 2, 1, 3)
    v = v.reshape(B, S, num_kv_heads, head_dim).transpose(0, 2, 1, 3)
    k = jnp.repeat(k, n_rep, axis=1)   # repeat_kv (repeat_interleave on heads)
    v = jnp.repeat(v, n_rep, axis=1)

    s = jnp.einsum("bhqd,bhkd->bhqk", q, k) / math.sqrt(head_dim)
    causal = jnp.tril(jnp.ones((S, S), dtype=bool))
    s = jnp.where(causal[None, None], s, -jnp.inf)
    p = jax.nn.softmax(s.astype(jnp.float32), axis=-1).astype(q.dtype)
    o = jnp.einsum("bhqk,bhkd->bhqd", p, v)
    o = o.transpose(0, 2, 1, 3).reshape(B, S, H)
    return o @ params["wo"].T


if __name__ == "__main__":
    # Small config consistent with the module (GQA, 64-dim heads).
    B, S = 2, 16
    num_heads = 4
    num_kv_heads = 2          # num_key_value_groups = 2
    head_dim = 64
    hidden_size = num_heads * head_dim   # 256

    key = jax.random.PRNGKey(0)
    kx, kq, kk_, kv_, ko = jax.random.split(key, 5)

    hidden_states = jax.random.normal(kx, (B, S, hidden_size), dtype=jnp.float32)

    def init_w(k, out_f, in_f):
        return (jax.random.normal(k, (out_f, in_f), dtype=jnp.float32)
                / math.sqrt(in_f))

    params = {
        "wq": init_w(kq, num_heads * head_dim, hidden_size),
        "wk": init_w(kk_, num_kv_heads * head_dim, hidden_size),
        "wv": init_w(kv_, num_kv_heads * head_dim, hidden_size),
        "wo": init_w(ko, hidden_size, num_heads * head_dim),
    }

    # Small tiles so the toy shapes exercise the multi-block online-softmax,
    # the causal block-skip and the K-reduction accumulation paths.
    out = helix_attention_forward(
        hidden_states, params, num_heads, num_kv_heads,
        tq=8, tkv=8, proj_tm=16, proj_tk=128,
        lin_tm=16, lin_tn=128, lin_tk=128)
    out = jax.block_until_ready(out)

    ref = reference_forward(hidden_states, params, num_heads, num_kv_heads)
    assert out.shape == (B, S, hidden_size)
    max_err = jnp.max(jnp.abs(out - ref))
    assert jnp.allclose(out, ref, atol=1e-4, rtol=1e-4), \
        f"max abs err = {max_err}"

    print("KERNEL_OK")
</pallas_src>

<mosaic_0001>
module attributes {stable_mosaic.version = 11 : i64} {
  func.func @_qkv_proj_kernel(%arg0: i32, %arg1: i32, %arg2: memref<16x128xf32, #tpu.memory_space<vmem>>, %arg3: memref<128x256xf32, #tpu.memory_space<vmem>>, %arg4: memref<128x128xf32, #tpu.memory_space<vmem>>, %arg5: memref<128x128xf32, #tpu.memory_space<vmem>>, %arg6: memref<16x256xf32, #tpu.memory_space<vmem>>, %arg7: memref<16x128xf32, #tpu.memory_space<vmem>>, %arg8: memref<16x128xf32, #tpu.memory_space<vmem>>, %arg9: memref<16x256xf32, #tpu.memory_space<vmem>>, %arg10: memref<16x128xf32, #tpu.memory_space<vmem>>, %arg11: memref<16x128xf32, #tpu.memory_space<vmem>>) attributes {dimension_semantics = [#tpu.dimension_semantics<parallel>, #tpu.dimension_semantics<arbitrary>], iteration_bounds = array<i64: 2, 2>, scalar_prefetch = 0 : i64, scratch_operands = 3 : i64, tpu.core_type = #tpu.core_type<tc>, window_params = [{transform_indices = @transform_0, window_bounds = array<i64: 16, 128>}, {transform_indices = @transform_1, window_bounds = array<i64: 128, 256>}, {transform_indices = @transform_2, window_bounds = array<i64: 128, 128>}, {transform_indices = @transform_3, window_bounds = array<i64: 128, 128>}, {transform_indices = @transform_4, window_bounds = array<i64: 16, 256>}, {transform_indices = @transform_5, window_bounds = array<i64: 16, 128>}, {transform_indices = @transform_6, window_bounds = array<i64: 16, 128>}]} {
    %c0_i32 = arith.constant 0 : i32
    %0 = arith.cmpi eq, %arg1, %c0_i32 : i32
    %1 = arith.extui %0 : i1 to i32
    %c0_i32_0 = arith.constant 0 : i32
    %2 = arith.cmpi ne, %1, %c0_i32_0 : i32
    scf.if %2 {
      %cst_23 = arith.constant 0.000000e+00 : f32
      %22 = vector.broadcast %cst_23 : f32 to vector<16x256xf32>
      %c0_24 = arith.constant 0 : index
      %c0_25 = arith.constant 0 : index
      %23 = vector.load %arg9[%c0_24, %c0_25] : memref<16x256xf32, #tpu.memory_space<vmem>>, vector<16x256xf32>
      tpu.vector_store %arg9[%c0_24, %c0_25], %22 {strides = array<i32>} : memref<16x256xf32, #tpu.memory_space<vmem>>, vector<16x256xf32>,
      %cst_26 = arith.constant 0.000000e+00 : f32
      %24 = vector.broadcast %cst_26 : f32 to vector<16x128xf32>
      %c0_27 = arith.constant 0 : index
      %c0_28 = arith.constant 0 : index
      %25 = vector.load %arg10[%c0_27, %c0_28] : memref<16x128xf32, #tpu.memory_space<vmem>>, vector<16x128xf32>
      tpu.vector_store %arg10[%c0_27, %c0_28], %24 {strides = array<i32>} : memref<16x128xf32, #tpu.memory_space<vmem>>, vector<16x128xf32>,
      %cst_29 = arith.constant 0.000000e+00 : f32
      %26 = vector.broadcast %cst_29 : f32 to vector<16x128xf32>
      %c0_30 = arith.constant 0 : index
      %c0_31 = arith.constant 0 : index
      %27 = vector.load %arg11[%c0_30, %c0_31] : memref<16x128xf32, #tpu.memory_space<vmem>>, vector<16x128xf32>
      tpu.vector_store %arg11[%c0_30, %c0_31], %26 {strides = array<i32>} : memref<16x128xf32, #tpu.memory_space<vmem>>, vector<16x128xf32>,
    } else {
    }
    %c0 = arith.constant 0 : index
    %c0_1 = arith.constant 0 : index
    %3 = vector.load %arg2[%c0, %c0_1] : memref<16x128xf32, #tpu.memory_space<vmem>>, vector<16x128xf32>
    %c0_2 = arith.constant 0 : index
    %c0_3 = arith.constant 0 : index
    %4 = vector.load %arg9[%c0_2, %c0_3] : memref<16x256xf32, #tpu.memory_space<vmem>>, vector<16x256xf32>
    %c0_4 = arith.constant 0 : index
    %c0_5 = arith.constant 0 : index
    %5 = vector.load %arg3[%c0_4, %c0_5] : memref<128x256xf32, #tpu.memory_space<vmem>>, vector<128x256xf32>
    %cst = arith.constant dense<0.000000e+00> : vector<16x256xf32>
    %6 = tpu.matmul %3, %5, %cst {dimension_numbers = #tpu.dot_dimension_numbers<[1], [0], [0], [1], [0, 0, 1, 1], [], []>} : vector<16x128xf32>, vector<128x256xf32>, vector<16x256xf32> -> vector<16x256xf32>
    %7 = arith.addf %4, %6 : vector<16x256xf32>
    %c0_6 = arith.constant 0 : index
    %c0_7 = arith.constant 0 : index
    %8 = vector.load %arg9[%c0_6, %c0_7] : memref<16x256xf32, #tpu.memory_space<vmem>>, vector<16x256xf32>
    tpu.vector_store %arg9[%c0_6, %c0_7], %7 {strides = array<i32>} : memref<16x256xf32, #tpu.memory_space<vmem>>, vector<16x256xf32>,
    %c0_8 = arith.constant 0 : index
    %c0_9 = arith.constant 0 : index
    %9 = vector.load %arg10[%c0_8, %c0_9] : memref<16x128xf32, #tpu.memory_space<vmem>>, vector<16x128xf32>
    %c0_10 = arith.constant 0 : index
    %c0_11 = arith.constant 0 : index
    %10 = vector.load %arg4[%c0_10, %c0_11] : memref<128x128xf32, #tpu.memory_space<vmem>>, vector<128x128xf32>
    %cst_12 = arith.constant dense<0.000000e+00> : vector<16x128xf32>
    %11 = tpu.matmul %3, %10, %cst_12 {dimension_numbers = #tpu.dot_dimension_numbers<[1], [0], [0], [1], [0, 0, 1, 1], [], []>} : vector<16x128xf32>, vector<128x128xf32>, vector<16x128xf32> -> vector<16x128xf32>
    %12 = arith.addf %9, %11 : vector<16x128xf32>
    %c0_13 = arith.constant 0 : index
    %c0_14 = arith.constant 0 : index
    %13 = vector.load %arg10[%c0_13, %c0_14] : memref<16x128xf32, #tpu.memory_space<vmem>>, vector<16x128xf32>
    tpu.vector_store %arg10[%c0_13, %c0_14], %12 {strides = array<i32>} : memref<16x128xf32, #tpu.memory_space<vmem>>, vector<16x128xf32>,
    %c0_15 = arith.constant 0 : index
    %c0_16 = arith.constant 0 : index
    %14 = vector.load %arg11[%c0_15, %c0_16] : memref<16x128xf32, #tpu.memory_space<vmem>>, vector<16x128xf32>
    %c0_17 = arith.constant 0 : index
    %c0_18 = arith.constant 0 : index
    %15 = vector.load %arg5[%c0_17, %c0_18] : memref<128x128xf32, #tpu.memory_space<vmem>>, vector<128x128xf32>
    %cst_19 = arith.constant dense<0.000000e+00> : vector<16x128xf32>
    %16 = tpu.matmul %3, %15, %cst_19 {dimension_numbers = #tpu.dot_dimension_numbers<[1], [0], [0], [1], [0, 0, 1, 1], [], []>} : vector<16x128xf32>, vector<128x128xf32>, vector<16x128xf32> -> vector<16x128xf32>
    %17 = arith.addf %14, %16 : vector<16x128xf32>
    %c0_20 = arith.constant 0 : index
    %c0_21 = arith.constant 0 : index
    %18 = vector.load %arg11[%c0_20, %c0_21] : memref<16x128xf32, #tpu.memory_space<vmem>>, vector<16x128xf32>
    tpu.vector_store %arg11[%c0_20, %c0_21], %17 {strides = array<i32>} : memref<16x128xf32, #tpu.memory_space<vmem>>, vector<16x128xf32>,
    %c1_i32 = arith.constant 1 : i32
    %19 = arith.cmpi eq, %arg1, %c1_i32 : i32
    %20 = arith.extui %19 : i1 to i32
    %c0_i32_22 = arith.constant 0 : i32
    %21 = arith.cmpi ne, %20, %c0_i32_22 : i32
    scf.if %21 {
      %c0_23 = arith.constant 0 : index
      %c0_24 = arith.constant 0 : index
      %22 = vector.load %arg9[%c0_23, %c0_24] : memref<16x256xf32, #tpu.memory_space<vmem>>, vector<16x256xf32>
      %c0_25 = arith.constant 0 : index
      %c0_26 = arith.constant 0 : index
      %23 = vector.load %arg6[%c0_25, %c0_26] : memref<16x256xf32, #tpu.memory_space<vmem>>, vector<16x256xf32>
      tpu.vector_store %arg6[%c0_25, %c0_26], %22 {strides = array<i32>} : memref<16x256xf32, #tpu.memory_space<vmem>>, vector<16x256xf32>,
      %c0_27 = arith.constant 0 : index
      %c0_28 = arith.constant 0 : index
      %24 = vector.load %arg10[%c0_27, %c0_28] : memref<16x128xf32, #tpu.memory_space<vmem>>, vector<16x128xf32>
      %c0_29 = arith.constant 0 : index
      %c0_30 = arith.constant 0 : index
      %25 = vector.load %arg7[%c0_29, %c0_30] : memref<16x128xf32, #tpu.memory_space<vmem>>, vector<16x128xf32>
      tpu.vector_store %arg7[%c0_29, %c0_30], %24 {strides = array<i32>} : memref<16x128xf32, #tpu.memory_space<vmem>>, vector<16x128xf32>,
      %c0_31 = arith.constant 0 : index
      %c0_32 = arith.constant 0 : index
      %26 = vector.load %arg11[%c0_31, %c0_32] : memref<16x128xf32, #tpu.memory_space<vmem>>, vector<16x128xf32>
      %c0_33 = arith.constant 0 : index
      %c0_34 = arith.constant 0 : index
      %27 = vector.load %arg8[%c0_33, %c0_34] : memref<16x128xf32, #tpu.memory_space<vmem>>, vector<16x128xf32>
      tpu.vector_store %arg8[%c0_33, %c0_34], %26 {strides = array<i32>} : memref<16x128xf32, #tpu.memory_space<vmem>>, vector<16x128xf32>,
    } else {
    }
    return
  }
  func.func @transform_0(%arg0: i32, %arg1: i32) -> (i32, i32) {
    %c0_i32 = arith.constant 0 : i32
    return %arg0, %arg1 : i32, i32
  }
  func.func @transform_1(%arg0: i32, %arg1: i32) -> (i32, i32) {
    %c0_i32 = arith.constant 0 : i32
    %c0_i32_0 = arith.constant 0 : i32
    return %arg1, %c0_i32 : i32, i32
  }
  func.func @transform_2(%arg0: i32, %arg1: i32) -> (i32, i32) {
    %c0_i32 = arith.constant 0 : i32
    %c0_i32_0 = arith.constant 0 : i32
    return %arg1, %c0_i32 : i32, i32
  }
  func.func @transform_3(%arg0: i32, %arg1: i32) -> (i32, i32) {
    %c0_i32 = arith.constant 0 : i32
    %c0_i32_0 = arith.constant 0 : i32
    return %arg1, %c0_i32 : i32, i32
  }
  func.func @transform_4(%arg0: i32, %arg1: i32) -> (i32, i32) {
    %c0_i32 = arith.constant 0 : i32
    %c0_i32_0 = arith.constant 0 : i32
    return %arg0, %c0_i32 : i32, i32
  }
  func.func @transform_5(%arg0: i32, %arg1: i32) -> (i32, i32) {
    %c0_i32 = arith.constant 0 : i32
    %c0_i32_0 = arith.constant 0 : i32
    return %arg0, %c0_i32 : i32, i32
  }
  func.func @transform_6(%arg0: i32, %arg1: i32) -> (i32, i32) {
    %c0_i32 = arith.constant 0 : i32
    %c0_i32_0 = arith.constant 0 : i32
    return %arg0, %c0_i32 : i32, i32
  }
}

</mosaic_0001>

<bundles_post_ra>
// kernel: tpu_custom_call.1
= control target key start
LH: loop header
LB: loop body
LE: loop exit
PB: predicated region body
PF: predicated region fallthrough
CT: control target
= control target key end

     0   :  { %s2472_s0 = inlined_call_operand.hbm [shape: f32[32,256], index: 0, kind: input, shape index: {}]   ;;  %s2473_s1 = inlined_call_operand.hbm [shape: f32[256,256], index: 1, kind: input, shape index: {}]   ;;  %s2474_s2 = inlined_call_operand.hbm [shape: f32[256,128], index: 2, kind: input, shape index: {}]   ;;  %s2475_s3 = inlined_call_operand.hbm [shape: f32[256,128], index: 3, kind: input, shape index: {}]   ;;  %s2476_s4 = inlined_call_operand.hbm [shape: f32[32,256], index: 4, kind: output, shape index: {0}]   ;;  %s2477_s5 = inlined_call_operand.hbm [shape: f32[32,128], index: 5, kind: output, shape index: {1}]   ;;  %s2478_s6 = inlined_call_operand.hbm [shape: f32[32,128], index: 6, kind: output, shape index: {2}]  }
   0x1   :  { %2505 = sst [smem:[#allocation34_spill]] %s2472_s0 }
   0x2   :  { %2506 = sst [smem:[#allocation35_spill]] %s2473_s1 }
   0x3   :  { %2507 = sst [smem:[#allocation36_spill]] %s2474_s2 }
   0x4   :  { %2508 = sst [smem:[#allocation37_spill]] %s2476_s4 }
   0x5   :  { %2509 = sst [smem:[#allocation38_spill]] %s2477_s5 }
   0x6   :  { %2510 = sst [smem:[#allocation39_spill]] %s2478_s6 }
   0x7   :  { %12 = vsyncpa [#allocation6], 0 }
   0x8   :  { %14 = vsyncpa [#allocation6 + $0x1], 0 }
   0x9   :  { %15 = vsyncpa [#allocation9], 0 }
   0xa   :  { %17 = vsyncpa [#allocation9 + $0x1], 0 }
   0xb   :  { %18 = vsyncpa [#allocation12], 0 }
   0xc   :  { %20 = vsyncpa [#allocation12 + $0x1], 0 }
   0xd   :  { %21 = vsyncpa [#allocation7], 0 }
   0xe   :  { %23 = vsyncpa [#allocation7 + $0x1], 0 }
   0xf   :  { %24 = vsyncpa [#allocation15], 0 }
  0x10   :  { %26 = vsyncpa [#allocation15 + $0x1], 0  ;;  %s1848_s21 = smov 0   ;;  %s1850_s22 = smov 0  }
  0x11   :  { %s1852_s23 = smov 0   ;;  %s1854_s24 = smov 0  }
  0x12   :  { %s1856_s25 = smov 0   ;;  %s1858_s26 = smov 0  }
  0x13   :  { %s1860_s27 = smov 0   ;;  %s1862_s28 = smov 0  }
  0x14   :  { %s1864_s29 = smov 0   ;;  %s1866_s30 = smov 0  }
  0x15   :  { %s1868_s7 = smov 0   ;;  %s1870_s8 = smov 0  }
  0x16   :  { %s1872_s9 = smov 0   ;;  %s1874_s10 = smov 0  }
  0x17 LB: > { %2511 = sst [smem:[#allocation22_spill]] %s1742_s21  ;;  %s1917_s11 = sadd.s32 4294967295, %s1794_s10   ;;  %s1794_s10 = sphi %s1874_s10, %s32_s10   ;;  %s1790_s9 = sphi %s1872_s9, %s2571_s9   ;;  %s1786_s8 = sphi %s1870_s8, %s2578_s8   ;;  %s1782_s7 = sphi %s1868_s7, %s2569_s7   ;;  %s1778_s30 = sphi %s1866_s30, %s2577_s30   ;;  %s1774_s29 = sphi %s1864_s29, %s2576_s29   ;;  %s1770_s28 = sphi %s1862_s28, %s2575_s28   ;;  %s1766_s27 = sphi %s1860_s27, %s2574_s27   ;;  %s1762_s26 = sphi %s1858_s26, %s2568_s26   ;;  %s1758_s25 = sphi %s1856_s25, %s2567_s25   ;;  %s1754_s24 = sphi %s1854_s24, %s2566_s24   ;;  %s1750_s23 = sphi %s1852_s23, %s2573_s23   ;;  %s1746_s22 = sphi %s1850_s22, %s2572_s22   ;;  %s1742_s21 = sphi %s1848_s21, %s2565_s21  }
  0x18   : > { %2512 = sst [smem:[#allocation23_spill]] %s1746_s22  ;;  %s41_s12 = sadd.s32 1, %s1786_s8 }
  0x19   : > { %2513 = sst [smem:[#allocation24_spill]] %s1758_s25  ;;  %p1920_p0 = scmp.ge.s32.totalorder %s41_s12, 2 }
  0x1a   : > { %2514 = sst [smem:[#allocation25_spill]] %s1762_s26  ;;  %p2487_p1 = scmp.eq.s32.totalorder %s1794_s10, 0 }
  0x1b   : > { %2515 = sst [smem:[#allocation26_spill]] %s1778_s30  ;;  %p2486_p2 = scmp.eq.s32.totalorder %s1917_s11, 0 }
  0x1c   : > { %2516 = sst [smem:[#allocation27_spill]] %s1782_s7  ;;  %s79_s14 = sadd.s32 1, %s1762_s26 }
  0x1d   : > { %2517 = sst [smem:[#allocation28_spill]] %s1790_s9  ;;  %s2580_s12 = smov (%p1920_p0, %s41_s12), 0 }
  0x1e   : > { %2518 = sst [smem:[#allocation29_spill]] %s1917_s11  ;;  %p86_p3 = scmp.ne.s32.totalorder %s1762_s26, %s1758_s25 }
  0x1f   : > { %s2519_s13 = scalar_select %p1920_p0, 1, 0 }
  0x20   : > { %2520 = sst [smem:[#allocation30_spill]] %s2580_s12  ;;  %p92_p4 = scmp.ne.s32.totalorder %s1758_s25, %s1754_s24 }
  0x21   : > { %s1936_s15 = ssub.s32 %s1786_s8, %s2580_s12  ;;  %p88_p7 = por %p86_p3, %p2487_p1 }
  0x22   : > { %p77_p6 = scmp.eq.s32.totalorder %s1936_s15, 0  ;;  %p1944_p8 = por %p92_p4, %p2486_p2 }
  0x23   : > { %p2485_p9 = scmp.lt.s32.totalorder %s1794_s10, 4  ;;  %s269_s18 = sand.u32 1, %s1794_s10  }
  0x24   : > { %s2521_s16 = scalar_select %p1944_p8, 1, 0 }
  0x25   : > { %s1949_s17 = scalar_select %p77_p6, %s1762_s26, %s79_s14  }
  0x26   : > { %2522 = sst [smem:[#allocation31_spill]] %s2521_s16  ;;  %s1954_s19 = sand.u32 1, %s1762_s26  }
  0x27   : > { %2523 = sst [smem:[#allocation32_spill]] %s1949_s17  ;;  %s1056_s20 = sshll.u32 %s1954_s19, 8 }
  0x28   : > { %s1090_s24 = sshll.u32 %s1786_s8, 12  ;;  %s2524_s1 = sld [smem:[#allocation35_spill]] }
  0x29   : > { %s273_s5 = scalar_lea.vmem [#allocation8], %s1056_s20  ;;  %p1967_p10 = pnand %p2485_p9, %p88_p7 }
  0x2a   : > { %s281_s7 = sshll.u32 %s273_s5, 4  ;;  %s1973_s17 = scalar_lea.sflag [#allocation9], %s269_s18  ;;  %s1963_s7 = int_to_ptr.vmem [resolvable:$true] %s281_s7 }
  0x2b   : > { %s2525_s14 = scalar_select %p1967_p10, 1, 0 }
  0x2c   : > { %p1979_p3 = pneg %p1967_p10 }
  0x2e   : > { %s1961_s6 = scalar_lea.hbm %s2524_s1, %s1090_s24  ;;  %s1465_s24 = scalar_lea.hbm %s2524_s1, 8192 }
  0x2f   : > { %s1460_s4 = scalar_lea.hbm %s1961_s6, 4096  ;;  %p1466_p7 = scmp.lt.u32.totalorder %s1961_s6, %s2524_s1 }
  0x30   : > { %p1461_p13 = scmp.ne.s32.totalorder %s1961_s6, %s1460_s4  ;;  %p1467_p9 = scmp.lt.u32.totalorder %s1465_s24, %s1460_s4 }
  0x31   : > { %p1469_p2 = scmp.lt.u32.totalorder %s1460_s4, %s1961_s6 }
  0x32   : > { %p1463_p4 = pnand %p1979_p3, %p1461_p13  ;;  %p1468_p5 = por %p1467_p9, %p1466_p7 }
  0x34   : > { %p1464_p6 = pneg %p1463_p4  ;;  %p1470_p1 = por %p1469_p2, %p1468_p5 }
  0x36   : > { %p1471_p11 = pnand %p1470_p1, %p1464_p6 }
  0x38   : > { %1474 = shalt.err (!%p1471_p11)
}
  0x39   : > { %s1475_s18 = scalar_lea.vmem %s1963_s7, 4096  ;;  %s1796_s5 = smov [#allocation8]  }
  0x3a   : > { %p1476_p13 = scmp.ne.s32.totalorder %s1963_s7, %s1475_s18  ;;  %s1480_s20 = sshll.u32 %s1796_s5, 4  ;;  %s1481_s20 = int_to_ptr.vmem [resolvable:$false] %s1480_s20 }
  0x3b   : > { %s1482_s26 = scalar_lea.vmem %s1481_s20, 8192  ;;  %p1483_p8 = scmp.lt.s32.totalorder %s1963_s7, %s1481_s20 }
  0x3c   : > { %p1478_p4 = pnand %p1476_p13, %p1979_p3  ;;  %p1484_p0 = scmp.lt.s32.totalorder %s1482_s26, %s1475_s18 }
  0x3e   : > { %p1479_p12 = pneg %p1478_p4  ;;  %p1485_p9 = por %p1484_p0, %p1483_p8 }
  0x40   : > { %p1486_p7 = pnand %p1485_p9, %p1479_p12 }
  0x42   : > { %1489 = shalt.err (!%p1486_p7)
}
  0x43   : > { %s2490_s30 = smov 256   ;;  %s1798_s4 = smov 16  }
  0x44   : > { %1319 = dma.hbm_to_vmem [thread:$0]  (!%p1967_p10), %s1961_s6, 4096, %s1963_s7, %s1973_s17, %s2490_s30, %s2490_s30, %s1798_s4  }
  0x45   : > { %p2527_p0 = scmp.lt.s32.totalorder %s1794_s10, 5  ;;  %p2528_p1 = scmp.ge.s32.totalorder %s1794_s10, 1 }
  0x46   : > { %s2492_s18 = sadd.s32 4294967294, %s1794_s10   ;;  %s44_s5 = sadd.s32 1, %s1790_s9 }
  0x47   : > { %p2009_p2 = pnand %p2528_p1, %p2527_p0  ;;  %s53_s20 = sadd.s32 1, %s1774_s29 }
  0x48   : > { %p2530_p5 = scmp.ne.s32.totalorder %s2519_s13, 0  ;;  %p60_p8 = scmp.ne.s32.totalorder %s1774_s29, %s1770_s28 }
  0x49   : > { %s2529_s24 = scalar_select %p2009_p2, 1, 0 }
  0x4a   : > { %s2582_s5 = smov (!%p2530_p5, %s44_s5), %s1790_s9  ;;  %p66_p11 = scmp.ne.s32.totalorder %s1770_s28, %s1766_s27 }
  0x4b   : > { %p46_p12 = scmp.ge.s32.totalorder %s2582_s5, 2  ;;  %s157_s6 = sadd.s32 1, %s1750_s23 }
  0x4c   : > { %p2531_p6 = scmp.eq.s32.totalorder %s1794_s10, 0  ;;  %p2533_p4 = scmp.eq.s32.totalorder %s1917_s11, 0 }
  0x4d   : > { %s2584_s5 = smov (%p46_p12, %s2582_s5), 0  ;;  %p167_p7 = scmp.ne.s32.totalorder %s1750_s23, %s1746_s22 }
  0x4e   : > { %p2026_p13 = por %p2531_p6, %p60_p8  ;;  %p2032_p9 = por %p2533_p4, %p66_p11 }
  0x4f   : > { %2535 = sst [smem:[#allocation33_spill]] %s2584_s5  ;;  %p173_p0 = scmp.ne.s32.totalorder %s1746_s22, %s1742_s21 }
  0x50   : > { %s2534_s26 = scalar_select %p2032_p9, 1, 0 }
  0x51   : > { %s48_s27 = ssub.s32 %s1790_s9, %s2584_s5  ;;  %p174_p1 = scmp.eq.s32.totalorder %s2492_s18, 3 }
  0x52   : > { %s50_s13 = sor.u32 %s1936_s15, %s48_s27  ;;  %p155_p5 = scmp.eq.s32.totalorder %s48_s27, 0 }
  0x53   : > { %p51_p8 = scmp.eq.s32.totalorder %s50_s13, 0  ;;  %p2536_p6 = scmp.eq.s32.totalorder %s1917_s11, 3 }
  0x54   : > { %s2054_s30 = scalar_select %p155_p5, %s1750_s23, %s157_s6  }
  0x55   : > { %p2049_p11 = por %p2536_p6, %p167_p7  ;;  %p2059_p12 = por %p174_p1, %p173_p0 }
  0x56   : > { %s2057_s1 = scalar_select %p51_p8, %s1774_s29, %s53_s20  }
  0x57   : > { %s2537_s4 = scalar_select %p2049_p11, 1, 0 }
  0x58   : > { %s2538_s21 = scalar_select %p2059_p12, 1, 0 }
  0x59   : > { %s246_s18 = sand.u32 1, %s1774_s29   ;;  %s1088_s5 = sshll.u32 %s1790_s9, 2 }
  0x5a   : > { %s1052_s15 = sshll.u32 %s246_s18, 4  ;;  %s256_s22 = sadd.s32 %s1786_s8, %s1088_s5 }
  0x5b   : > { %s250_s27 = scalar_lea.vmem [#allocation5], %s1052_s15  ;;  %s1055_s13 = sshll.u32 %s256_s22, 7 }
  0x5c   : > { %s259_s16 = sshll.u32 %s250_s27, 4  ;;  %s2539_s0 = sld [smem:[#allocation34_spill]]  ;;  %s2066_s16 = int_to_ptr.vmem [resolvable:$true] %s259_s16 }
  0x5d   : > { %p2540_p4 = scmp.lt.s32.totalorder %s1794_s10, 4  ;;  %s1060_s22 = sshll.u32 %s1954_s19, 7 }
  0x5e   : > { %s2082_s5 = scalar_lea.sflag [#allocation6], %s246_s18 }
  0x5f   : > { %p2077_p7 = pnand %p2540_p4, %p2026_p13 }
  0x61   : > { %p1492_p1 = pneg %p2077_p7 }
  0x62   : > { %s2071_s6 = scalar_lea.hbm %s2539_s0, %s1055_s13  ;;  %s1495_s7 = scalar_lea.hbm %s2539_s0, 1024 }
  0x63   : > { %s1490_s15 = scalar_lea.hbm %s2071_s6, 256  ;;  %p1496_p13 = scmp.lt.u32.totalorder %s2071_s6, %s2539_s0 }
  0x64   : > { %p1491_p0 = scmp.ne.s32.totalorder %s2071_s6, %s1490_s15  ;;  %p1497_p6 = scmp.lt.u32.totalorder %s1495_s7, %s1490_s15 }
  0x65   : > { %p1499_p12 = scmp.lt.u32.totalorder %s1490_s15, %s2071_s6 }
  0x66   : > { %p1493_p5 = pnand %p1492_p1, %p1491_p0  ;;  %p1498_p4 = por %p1497_p6, %p1496_p13 }
  0x68   : > { %p1494_p8 = pneg %p1493_p5  ;;  %p1500_p11 = por %p1499_p12, %p1498_p4 }
  0x6a   : > { %p1501_p9 = pnand %p1500_p11, %p1494_p8 }
  0x6c   : > { %1504 = shalt.err (!%p1501_p9)
}
  0x6d   : > { %s1505_s18 = scalar_lea.vmem %s2066_s16, 256  ;;  %s1799_s25 = smov [#allocation5]  }
  0x6e   : > { %p1506_p0 = scmp.ne.s32.totalorder %s2066_s16, %s1505_s18  ;;  %s1510_s11 = sshll.u32 %s1799_s25, 4  ;;  %s1511_s11 = int_to_ptr.vmem [resolvable:$false] %s1510_s11 }
  0x6f   : > { %s1512_s27 = scalar_lea.vmem %s1511_s11, 512  ;;  %p1513_p10 = scmp.lt.s32.totalorder %s2066_s16, %s1511_s11 }
  0x70   : > { %p1508_p5 = pnand %p1506_p0, %p1492_p1  ;;  %p1514_p13 = scmp.lt.s32.totalorder %s1512_s27, %s1505_s18 }
  0x72   : > { %p1509_p2 = pneg %p1508_p5  ;;  %p1515_p6 = por %p1514_p13, %p1513_p10 }
  0x74   : > { %p1516_p12 = pnand %p1515_p6, %p1509_p2 }
  0x76   : > { %1519 = shalt.err (!%p1516_p12)
}
  0x77   : > { %s1800_s15 = smov 128   ;;  %s1801_s7 = smov 8  }
  0x78   : > { %s2542_s13 = smov 256   ;;  %s1091_s25 = sshll.u32 %s1786_s8, 11 }
  0x79   : > { %1316 = dma.hbm_to_vmem [thread:$0]  (!%p2077_p7), %s2071_s6, 256, %s2066_s16, %s2082_s5, %s2542_s13, %s1800_s15, %s1801_s7  }
  0x7a   : > { %s2543_s2 = sld [smem:[#allocation36_spill]]  ;;  %s295_s0 = scalar_lea.vmem [#allocation10], %s1060_s22 }
  0x7b   : > { %s302_s9 = sshll.u32 %s295_s0, 4  ;;  %s2123_s9 = int_to_ptr.vmem [resolvable:$true] %s302_s9 }
  0x80   : > { %s2119_s27 = scalar_lea.hbm %s2543_s2, %s1091_s25  ;;  %s1525_s5 = scalar_lea.hbm %s2543_s2, 4096 }
  0x81   : > { %s1520_s20 = scalar_lea.hbm %s2119_s27, 2048  ;;  %p1526_p11 = scmp.lt.u32.totalorder %s2119_s27, %s2543_s2 }
  0x82   : > { %p1521_p10 = scmp.ne.s32.totalorder %s2119_s27, %s1520_s20  ;;  %p1527_p7 = scmp.lt.u32.totalorder %s1525_s5, %s1520_s20 }
  0x83   : > { %p1529_p8 = scmp.lt.u32.totalorder %s1520_s20, %s2119_s27 }
  0x84   : > { %p1523_p2 = pnand %p1521_p10, %p1979_p3  ;;  %p1528_p1 = por %p1527_p7, %p1526_p11 }
  0x86   : > { %p1524_p9 = pneg %p1523_p2  ;;  %p1530_p4 = por %p1529_p8, %p1528_p1 }
  0x88   : > { %p1531_p0 = pnand %p1530_p4, %p1524_p9 }
  0x8a   : > { %1534 = shalt.err (!%p1531_p0)
}
  0x8b   : > { %s1535_s0 = scalar_lea.vmem %s2123_s9, 2048  ;;  %s1802_s11 = smov [#allocation10]  }
  0x8c   : > { %p1536_p5 = scmp.ne.s32.totalorder %s2123_s9, %s1535_s0  ;;  %s1540_s16 = sshll.u32 %s1802_s11, 4  ;;  %s1541_s16 = int_to_ptr.vmem [resolvable:$false] %s1540_s16 }
  0x8d   : > { %s1542_s6 = scalar_lea.vmem %s1541_s16, 4096  ;;  %p1543_p12 = scmp.lt.s32.totalorder %s2123_s9, %s1541_s16 }
  0x8e   : > { %p1538_p13 = pnand %p1536_p5, %p1979_p3  ;;  %p1544_p10 = scmp.lt.s32.totalorder %s1542_s6, %s1535_s0 }
  0x90   : > { %p1539_p6 = pneg %p1538_p13  ;;  %p1545_p2 = por %p1544_p10, %p1543_p12 }
  0x92   : > { %p1546_p11 = pnand %p1545_p2, %p1539_p6 }
  0x94   : > { %1549 = shalt.err (!%p1546_p11)
}
  0x95   : > { %p2544_p9 = scmp.ne.s32.totalorder %s2525_s14, 0  ;;  %s2155_s13 = scalar_lea.hbm %s2475_s3, %s1091_s25 }
  0x96   : > { %s316_s18 = scalar_lea.vmem [#allocation11], %s1060_s22  ;;  %s313_s11 = scalar_lea.sflag [#allocation12], %s1954_s19 }
  0x97   : > { %1322 = dma.hbm_to_vmem [thread:$0]  (!%p2544_p9), %s2119_s27, 2048, %s2123_s9, %s1973_s17, %s1800_s15, %s1800_s15, %s1801_s7  }
  0x98   : > { %s323_s0 = sshll.u32 %s316_s18, 4  ;;  %s1550_s16 = scalar_lea.hbm %s2155_s13, 2048  ;;  %s2159_s0 = int_to_ptr.vmem [resolvable:$true] %s323_s0 }
  0x99   : > { %p1551_p7 = scmp.ne.s32.totalorder %s2155_s13, %s1550_s16  ;;  %s1555_s25 = scalar_lea.hbm %s2475_s3, 4096 }
  0x9a   : > { %p1556_p4 = scmp.lt.u32.totalorder %s2155_s13, %s2475_s3  ;;  %p1557_p0 = scmp.lt.u32.totalorder %s1555_s25, %s1550_s16 }
  0x9b   : > { %p1553_p1 = pnand %p1551_p7, %p1979_p3  ;;  %p1559_p13 = scmp.lt.u32.totalorder %s1550_s16, %s2155_s13 }
  0x9c   : > { %p1558_p5 = por %p1557_p0, %p1556_p4 }
  0x9d   : > { %p1554_p8 = pneg %p1553_p1 }
  0x9e   : > { %p1560_p6 = por %p1559_p13, %p1558_p5 }
  0xa0   : > { %p1561_p12 = pnand %p1560_p6, %p1554_p8 }
  0xa2   : > { %1564 = shalt.err (!%p1561_p12)
}
  0xa3   : > { %s1565_s22 = scalar_lea.vmem %s2159_s0, 2048  ;;  %s1803_s20 = smov [#allocation11]  }
  0xa4   : > { %p1566_p10 = scmp.ne.s32.totalorder %s2159_s0, %s1565_s22  ;;  %s1570_s5 = sshll.u32 %s1803_s20, 4  ;;  %s1571_s5 = int_to_ptr.vmem [resolvable:$false] %s1570_s5 }
  0xa5   : > { %s1572_s18 = scalar_lea.vmem %s1571_s5, 4096  ;;  %p1573_p7 = scmp.lt.s32.totalorder %s2159_s0, %s1571_s5 }
  0xa6   : > { %p1568_p2 = pnand %p1566_p10, %p1979_p3  ;;  %p1574_p1 = scmp.lt.s32.totalorder %s1572_s18, %s1565_s22 }
  0xa8   : > { %p1569_p11 = pneg %p1568_p2  ;;  %p1575_p4 = por %p1574_p1, %p1573_p7 }
  0xaa   : > { %p1576_p0 = pnand %p1575_p4, %p1569_p11 }
  0xac   : > { %1579 = shalt.err (!%p1576_p0)
}
  0xad   : > { %1325 = dma.hbm_to_vmem [thread:$0]  (!%p2544_p9), %s2155_s13, 2048, %s2159_s0, %s313_s11, %s1800_s15, %s1800_s15, %s1801_s7  }
  0xae   : > { %p2545_p3 = scmp.ne.s32.totalorder %s2529_s24, 0 }
  0xaf   : > { %s337_s12 = sand.u32 (!%p2545_p3), 1, %s1770_s28   ;;  %p2546_p8 = scmp.ne.s32.totalorder (!%p2545_p3), %s2534_s26, 0 }
  0xb0   : > { %335 = sbr.rel (%p2545_p3) target bundleno = 585 (0x249), region = 36  ;;  %s2191_s16 = sshll.u32 (!%p2545_p3), %s337_s12, 4 }
  0xb1   : > { %s338_s9 = scalar_lea.sflag (!%p2545_p3), [#allocation6], %s337_s12  ;;  %s341_s17 = scalar_lea.vmem (!%p2545_p3), [#allocation5], %s2191_s16 }
  0xb7   : > { %1721 = dma.done.wait (%p2546_p8), %s338_s9, 256  }
  0xb8   : > { %1723 = vsyncadd (%p2546_p8), %s338_s9, 4294967040  ;;  %s2547_s19 = sld [smem:[#allocation29_spill]]  ;;  %s2548_s14 = sld [smem:[#allocation24_spill]] }
  0xb9   : > { %s2549_s15 = sld [smem:[#allocation31_spill]] }
  0xbe   : > { %s346_s7 = sand.u32 1, %s2547_s19   ;;  %s348_s24 = sand.u32 1, %s2548_s14  }
  0xbf   : > { %s1068_s13 = sshll.u32 %s348_s24, 8  ;;  %s347_s0 = scalar_lea.sflag [#allocation9], %s346_s7 }
  0xc0   : > { %s2202_s11 = scalar_lea.vmem [#allocation8], %s1068_s13  ;;  %p2550_p9 = scmp.ne.s32.totalorder %s2549_s15, 0 }
  0xc2   : > { %1725 = dma.done.wait (%p2550_p9), %s347_s0, 6144  }
  0xc3   : > { %1727 = vsyncadd (%p2550_p9), %s347_s0, 4294961152  ;;  %s1069_s25 = sshll.u32 %s348_s24, 7  ;;  %s365_s27 = scalar_lea.sflag [#allocation12], %s348_s24 }
  0xc4   : > { %s2208_s26 = scalar_lea.vmem [#allocation10], %s1069_s25  ;;  %s2210_s6 = scalar_lea.vmem [#allocation11], %s1069_s25 }
  0xc5   : > { %1729 = dma.done.wait (%p2550_p9), %s365_s27, 2048  }
  0xc6   : > { %1731 = vsyncadd (%p2550_p9), %s365_s27, 4294965248  ;;  %s2551_s22 = sld [smem:[#allocation23_spill]] }
  0xc7   : > { %s2552_s14 = sld [smem:[#allocation26_spill]] }
  0xcc   : > { %s2217_s20 = sand.u32 1, %s2551_s22  }
  0xcd   : > { %s1071_s5 = sshll.u32 %s2217_s20, 5  ;;  %s1072_s18 = sshll.u32 %s2217_s20, 4 }
  0xce   : > { %s2221_s12 = scalar_lea.vmem [#allocation13], %s1071_s5  ;;  %s2223_s9 = scalar_lea.vmem [#allocation14], %s1072_s18 }
  0xcf   : > { %s2225_s19 = scalar_lea.vmem [#allocation16], %s1072_s18  ;;  %p1074_p5 = scmp.ne.s32.totalorder %s2552_s14, 0 }
  0xd0   : > { %v1804_v0 = vmov (!%p1074_p5), 0.0  }
  0xd1   : > { %432 = sbr.rel (%p1074_p5) target bundleno = 216 (0xd8), region = 56  ;;  %433 = vst [vmem:[#allocation2] sm:$0xff] (!%p1074_p5), %v1804_v0  ;;  %434 = vst [vmem:[#allocation2 + $0x8] sm:$0xff] (!%p1074_p5), %v1804_v0 }
  0xd2   : > { %435 = vst [vmem:[#allocation2 + $0x10] sm:$0xff] (!%p1074_p5), %v1804_v0  ;;  %436 = vst [vmem:[#allocation2 + $0x18] sm:$0xff] (!%p1074_p5), %v1804_v0 }
  0xd3   : > { %437 = vst [vmem:[#allocation3] sm:$0xff] (!%p1074_p5), %v1804_v0  ;;  %438 = vst [vmem:[#allocation3 + $0x8] sm:$0xff] (!%p1074_p5), %v1804_v0 }
  0xd4   : > { %439 = vst [vmem:[#allocation4] sm:$0xff] (!%p1074_p5), %v1804_v0  ;;  %440 = vst [vmem:[#allocation4 + $0x8] sm:$0xff] (!%p1074_p5), %v1804_v0 }
  0xd8 PF: > { %v448_v1 = vld [vmem:[%s2202_s11 + $0x8] sm:$0xff]  ;;  %v450_v2 = vld [vmem:[%s2202_s11 + $0x18] sm:$0xff]  ;;  %v447_v3 = vld [vmem:[%s2202_s11] sm:$0xff]  ;;  %v1805_v8 = vmov 0.0   ;;  %s2553_s16 = sld [smem:[#allocation26_spill]] }
  0xd9   : > { %v1203_v4 = vpack.c.bf16 %v450_v2, %v448_v1  ;;  %v449_v5 = vld [vmem:[%s2202_s11 + $0x10] sm:$0xff]  ;;  %v452_v6 = vld [vmem:[%s2202_s11 + $0x28] sm:$0xff]  ;;  %v454_v7 = vld [vmem:[%s2202_s11 + $0x38] sm:$0xff]  ;;  %543 = vmatprep.mubr.f32.mxu0 %v1805_v8 }
  0xda   : > { %v1205_v9 = vpack.c.bf16 %v449_v5, %v447_v3  ;;  %v1207_v10 = vpack.c.bf16 %v454_v7, %v452_v6  ;;  %v451_v11 = vld [vmem:[%s2202_s11 + $0x20] sm:$0xff]  ;;  %v453_v12 = vld [vmem:[%s2202_s11 + $0x30] sm:$0xff]  ;;  %v456_v13 = vld [vmem:[%s2202_s11 + $0x48] sm:$0xff] }
  0xdb   : > { %1204 = vmatprep.subr.bf16.mxu0 %v1203_v4  ;;  %v458_v14 = vld [vmem:[%s2202_s11 + $0x58] sm:$0xff]  ;;  %v1209_v15 = vpack.c.bf16 %v453_v12, %v451_v11  ;;  %v455_v17 = vld [vmem:[%s2202_s11 + $0x40] sm:$0xff]  ;;  %v457_v18 = vld [vmem:[%s2202_s11 + $0x50] sm:$0xff] }
  0xdc   : > { %1206 = vmatpush1.bf16.msra.mxu0 %v1205_v9  ;;  %v1211_v16 = vpack.c.bf16 %v458_v14, %v456_v13  ;;  %v460_v19 = vld [vmem:[%s2202_s11 + $0x68] sm:$0xff]  ;;  %v462_v20 = vld [vmem:[%s2202_s11 + $0x78] sm:$0xff]  ;;  %v1213_v21 = vpack.c.bf16 %v457_v18, %v455_v17  ;;  %v459_v23 = vld [vmem:[%s2202_s11 + $0x60] sm:$0xff] }
  0xdd   : > { %1208 = vmatprep.subr.bf16.mxu0 %v1207_v10  ;;  %v1215_v22 = vpack.c.bf16 %v462_v20, %v460_v19  ;;  %v461_v24 = vld [vmem:[%s2202_s11 + $0x70] sm:$0xff]  ;;  %v464_v25 = vld [vmem:[%s2202_s11 + $0x88] sm:$0xff]  ;;  %v466_v26 = vld [vmem:[%s2202_s11 + $0x98] sm:$0xff] }
  0xde   : > { %v566_v27 = vld [vmem:[%s2208_s26] sm:$0xff]  ;;  %v567_v28 = vld [vmem:[%s2208_s26 + $0x8] sm:$0xff]  ;;  %v1217_v30 = vpack.c.bf16 %v461_v24, %v459_v23  ;;  %v568_v32 = vld [vmem:[%s2208_s26 + $0x10] sm:$0xff]  ;;  %v1219_v34 = vpack.c.bf16 %v466_v26, %v464_v25  ;;  %p1075_p13 = scmp.ne.s32.totalorder %s2553_s16, 1 }
  0xdf   : > { %v2251_v29 = vld [vmem:[%s341_s17] sm:$0xff]  ;;  %v1235_v31 = vpack.c.bf16 %v567_v28, %v566_v27  ;;  %v569_v33 = vld [vmem:[%s2208_s26 + $0x18] sm:$0xff]  ;;  %v468_v39 = vld [vmem:[%s2202_s11 + $0xa8] sm:$0xff] }
  0xe0   : > { %1210 = vmatpush1.bf16.msra.mxu0 %v1209_v15  ;;  %1165 = vmatprep.mubr.f32.mxu1 %v2251_v29  ;;  %v463_v35 = vld [vmem:[%s2202_s11 + $0x80] sm:$0xff]  ;;  %v465_v36 = vld [vmem:[%s2202_s11 + $0x90] sm:$0xff]  ;;  %v1239_v37 = vpack.c.bf16 %v569_v33, %v568_v32  ;;  %v470_v40 = vld [vmem:[%s2202_s11 + $0xb8] sm:$0xff] }
  0xe1   : > { %1212 = vmatprep.subr.bf16.mxu0 %v1211_v16  ;;  %v570_v38 = vld [vmem:[%s2208_s26 + $0x20] sm:$0xff]  ;;  %1236 = vmatprep.subr.bf16.mxu1 %v1235_v31  ;;  %v571_v41 = vld [vmem:[%s2208_s26 + $0x28] sm:$0xff]  ;;  %v1221_v42 = vpack.c.bf16 %v465_v36, %v463_v35  ;;  %v1223_v45 = vpack.c.bf16 %v470_v40, %v468_v39  ;;  %v469_v46 = vld [vmem:[%s2202_s11 + $0xb0] sm:$0xff] }
  0xe2   : > { %1238 = vmatpush3.bf16.msra.mxu1 %v1235_v31  ;;  %v467_v43 = vld [vmem:[%s2202_s11 + $0xa0] sm:$0xff]  ;;  %v1243_v44 = vpack.c.bf16 %v571_v41, %v570_v38  ;;  %v572_v47 = vld [vmem:[%s2208_s26 + $0x30] sm:$0xff]  ;;  %v573_v48 = vld [vmem:[%s2208_s26 + $0x38] sm:$0xff] }
  0xe3   : > { %1240 = vmatprep.subr.bf16.mxu1 %v1239_v37  ;;  %v472_v49 = vld [vmem:[%s2202_s11 + $0xc8] sm:$0xff]  ;;  %v474_v50 = vld [vmem:[%s2202_s11 + $0xd8] sm:$0xff]  ;;  %v1225_v51 = vpack.c.bf16 %v469_v46, %v467_v43  ;;  %v471_v52 = vld [vmem:[%s2202_s11 + $0xc0] sm:$0xff]  ;;  %v1247_v53 = vpack.c.bf16 %v573_v48, %v572_v47 }
  0xe4   : > { %1214 = vmatpush1.bf16.msra.mxu0 %v1213_v21  ;;  %v1227_v54 = vpack.c.bf16 %v474_v50, %v472_v49  ;;  %v473_v55 = vld [vmem:[%s2202_s11 + $0xd0] sm:$0xff]  ;;  %v574_v56 = vld [vmem:[%s2208_s26 + $0x40] sm:$0xff]  ;;  %v575_v57 = vld [vmem:[%s2208_s26 + $0x48] sm:$0xff] }
  0xe5   : > { %1216 = vmatprep.subr.bf16.mxu0 %v1215_v22  ;;  %v476_v58 = vld [vmem:[%s2202_s11 + $0xe8] sm:$0xff]  ;;  %v478_v59 = vld [vmem:[%s2202_s11 + $0xf8] sm:$0xff]  ;;  %v1229_v60 = vpack.c.bf16 %v473_v55, %v471_v52  ;;  %v475_v61 = vld [vmem:[%s2202_s11 + $0xe0] sm:$0xff]  ;;  %v1251_v62 = vpack.c.bf16 %v575_v57, %v574_v56 }
  0xe6   : > { %1242 = vmatpush3.bf16.msra.mxu1 %v1239_v37  ;;  %v1231_v63 = vpack.c.bf16 %v478_v59, %v476_v58  ;;  %v477_v0 = vld [vmem:[%s2202_s11 + $0xf0] sm:$0xff]  ;;  %v577_v2 = vld [vmem:[%s2208_s26 + $0x58] sm:$0xff]  ;;  %v663_v3 = vld [vmem:[%s2210_s6] sm:$0xff] }
  0xe7   : > { %1244 = vmatprep.subr.bf16.mxu1 %v1243_v44  ;;  %v576_v1 = vld [vmem:[%s2208_s26 + $0x50] sm:$0xff]  ;;  %v664_v4 = vld [vmem:[%s2210_s6 + $0x8] sm:$0xff]  ;;  %v1233_v5 = vpack.c.bf16 %v477_v0, %v475_v61  ;;  %v578_v9 = vld [vmem:[%s2208_s26 + $0x60] sm:$0xff] }
  0xe8   : > { %1218 = vmatpush1.bf16.msra.mxu0 %v1217_v30  ;;  %v1255_v6 = vpack.c.bf16 %v577_v2, %v576_v1  ;;  %v1267_v7 = vpack.c.bf16 %v664_v4, %v663_v3  ;;  %v579_v10 = vld [vmem:[%s2208_s26 + $0x68] sm:$0xff]  ;;  %v665_v11 = vld [vmem:[%s2210_s6 + $0x10] sm:$0xff]  ;;  %v666_v12 = vld [vmem:[%s2210_s6 + $0x18] sm:$0xff] }
  0xe9   : > { %1220 = vmatprep.subr.bf16.mxu0 %v1219_v34  ;;  %v1259_v13 = vpack.c.bf16 %v579_v10, %v578_v9  ;;  %v1271_v14 = vpack.c.bf16 %v666_v12, %v665_v11  ;;  %v580_v15 = vld [vmem:[%s2208_s26 + $0x70] sm:$0xff]  ;;  %v581_v16 = vld [vmem:[%s2208_s26 + $0x78] sm:$0xff]  ;;  %v667_v17 = vld [vmem:[%s2210_s6 + $0x20] sm:$0xff] }
  0xea   : > { %1246 = vmatpush3.bf16.msra.mxu1 %v1243_v44  ;;  %v668_v18 = vld [vmem:[%s2210_s6 + $0x28] sm:$0xff]  ;;  %v1263_v20 = vpack.c.bf16 %v581_v16, %v580_v15  ;;  %v669_v22 = vld [vmem:[%s2210_s6 + $0x30] sm:$0xff]  ;;  %v670_v23 = vld [vmem:[%s2210_s6 + $0x38] sm:$0xff] }
  0xeb   : > { %1248 = vmatprep.subr.bf16.mxu1 %v1247_v53  ;;  %v442_v19 = vld [vmem:[%s341_s17 + $0x8] sm:$0xff]  ;;  %v1275_v21 = vpack.c.bf16 %v668_v18, %v667_v17  ;;  %v1279_v24 = vpack.c.bf16 %v670_v23, %v669_v22  ;;  %v671_v25 = vld [vmem:[%s2210_s6 + $0x40] sm:$0xff]  ;;  %v673_v27 = vld [vmem:[%s2210_s6 + $0x50] sm:$0xff] }
  0xec   : > { %1222 = vmatpush1.bf16.msra.mxu0 %v1221_v42  ;;  %v672_v26 = vld [vmem:[%s2210_s6 + $0x48] sm:$0xff]  ;;  %v674_v28 = vld [vmem:[%s2210_s6 + $0x58] sm:$0xff]  ;;  %v675_v31 = vld [vmem:[%s2210_s6 + $0x60] sm:$0xff] }
  0xed   : > { %1224 = vmatprep.subr.bf16.mxu0 %v1223_v45  ;;  %v1287_v30 = vpack.c.bf16 %v674_v28, %v673_v27  ;;  %v676_v32 = vld [vmem:[%s2210_s6 + $0x68] sm:$0xff]  ;;  %v678_v34 = vld [vmem:[%s2210_s6 + $0x78] sm:$0xff]  ;;  %v443_v36 = vld [vmem:[#allocation2] sm:$0xff] }
  0xee   : > { %1250 = vmatpush3.bf16.msra.mxu1 %v1247_v53  ;;  %v1291_v33 = vpack.c.bf16 %v676_v32, %v675_v31  ;;  %v444_v37 = vld [vmem:[#allocation2 + $0x8] sm:$0xff]  ;;  %v445_v42 = vld [vmem:[#allocation2 + $0x10] sm:$0xff]  ;;  %v446_v43 = vld [vmem:[#allocation2 + $0x18] sm:$0xff] }
  0xef   : > { %1252 = vmatprep.subr.bf16.mxu1 %v1251_v62  ;;  %v565_v48 = vld [vmem:[#allocation3 + $0x8] sm:$0xff]  ;;  %v564_v49 = vld [vmem:[#allocation3] sm:$0xff]  ;;  %v661_v55 = vld [vmem:[#allocation4] sm:$0xff] }
  0xf0   : > { %1226 = vmatpush1.bf16.msra.mxu0 %v1225_v51 }
  0xf1   : > { %1228 = vmatprep.subr.bf16.mxu0 %v1227_v54  ;;  %v662_v54 = vld [vmem:[#allocation4 + $0x8] sm:$0xff] }
  0xf2   : > { %1254 = vmatpush3.bf16.msra.mxu1 %v1251_v62 }
  0xf3   : > { %1256 = vmatprep.subr.bf16.mxu1 %v1255_v6 }
  0xf4   : > { %1230 = vmatpush1.bf16.msra.mxu0 %v1229_v60 }
  0xf5   : > { %1232 = vmatprep.subr.bf16.mxu0 %v1231_v63 }
  0xf6   : > { %1258 = vmatpush3.bf16.msra.mxu1 %v1255_v6 }
  0xf7   : > { %1260 = vmatprep.subr.bf16.mxu1 %v1259_v13 }
  0xf8   : > { %1234 = vmatpush1.bf16.msra.mxu0 %v1233_v5 }
  0xf9   : > { %1268 = vmatprep.subr.bf16.mxu0 %v1267_v7 }
  0xfa   : > { %1262 = vmatpush3.bf16.msra.mxu1 %v1259_v13 }
  0xfb   : > { %544 = vmatmul.mubr.f32.vlgmr.msra.gmra.mrb[0].mxu0 %v2251_v29  ;;  %1264 = vmatprep.subr.bf16.mxu1 %v1263_v20 }
  0xfc   : > { %1270 = vmatpush3.bf16.msra.mxu0 %v1267_v7  ;;  %549 = vmatprep.mubr.f32.mxu0 %v1805_v8  ;;  %v1283_v8 = vpack.c.bf16 %v672_v26, %v671_v25 }
  0xfd   : > { %1272 = vmatprep.subr.bf16.mxu0 %v1271_v14 }
  0xfe   : > { %1266 = vmatpush3.bf16.msra.mxu1 %v1263_v20 }
  0xff   : > { %550 = vmatmul.mubr.f32.gmra.mrb[2].mxu0 %v442_v19 }
 0x100   : > { %1274 = vmatpush3.bf16.msra.mxu0 %v1271_v14  ;;  %1200 = vmatprep.mubr.f32.mxu0 %v2251_v29  ;;  %v677_v29 = vld [vmem:[%s2210_s6 + $0x70] sm:$0xff] }
 0x101   : > { %1276 = vmatprep.subr.bf16.mxu0 %v1275_v21  ;;  %1166 = vmatmul.mubr.f32.vlgmr.msra.gmra.mrb[0].mxu1 %v442_v19  ;;  %v1295_v35 = vpack.c.bf16 %v678_v34, %v677_v29 }
 0x104   : > { %1278 = vmatpush3.bf16.msra.mxu0 %v1275_v21 }
 0x105   : > { %1280 = vmatprep.subr.bf16.mxu0 %v1279_v24 }
 0x108   : > { %1282 = vmatpush3.bf16.msra.mxu0 %v1279_v24 }
 0x109   : > { %1284 = vmatprep.subr.bf16.mxu0 %v1283_v8 }
 0x10c   : > { %1286 = vmatpush3.bf16.msra.mxu0 %v1283_v8 }
 0x10d   : > { %1288 = vmatprep.subr.bf16.mxu0 %v1287_v30 }
 0x110   : > { %1290 = vmatpush3.bf16.msra.mxu0 %v1287_v30 }
 0x111   : > { %1292 = vmatprep.subr.bf16.mxu0 %v1291_v33 }
 0x114   : > { %1294 = vmatpush3.bf16.msra.mxu0 %v1291_v33 }
 0x115   : > { %1296 = vmatprep.subr.bf16.mxu0 %v1295_v35 }
 0x118   : > { %1298 = vmatpush3.bf16.msra.mxu0 %v1295_v35 }
 0x11b   : > { %1201 = vmatmul.mubr.f32.vlgmr.msra.gmra.mrb[4].mxu0 %v442_v19 }
 0x1ce   : > { %v545_v38 = vpop.f32.mrb[0].mxu0 }
 0x1cf   : > { %v556_v39 = vadd.f32 %v545_v38, %v443_v36  ;;  %v547_v40 = vpop.f32.mrb[1].mxu0 }
 0x1d0   : > { %v557_v41 = vadd.f32 %v547_v40, %v444_v37 }
 0x1d1   : > { %560 = vst [vmem:[#allocation2] sm:$0xff] %v556_v39 }
 0x1d2   : > { %561 = vst [vmem:[#allocation2 + $0x8] sm:$0xff] %v557_v41  ;;  %v551_v44 = vpop.f32.mrb[2].mxu0 }
 0x1d3   : > { %v558_v45 = vadd.f32 %v551_v44, %v445_v42  ;;  %v553_v46 = vpop.f32.mrb[3].mxu0 }
 0x1d4   : > { %v559_v47 = vadd.f32 %v553_v46, %v446_v43  ;;  %v1167_v50 = vpop.f32.mrb[0].mxu1 }
 0x1d5   : > { %562 = vst [vmem:[#allocation2 + $0x10] sm:$0xff] %v558_v45  ;;  %v658_v51 = vadd.f32 %v1167_v50, %v565_v48  ;;  %v648_v52 = vpop.f32.mrb[1].mxu1 }
 0x1d6   : > { %563 = vst [vmem:[#allocation2 + $0x18] sm:$0xff] %v559_v47  ;;  %v657_v53 = vadd.f32 %v648_v52, %v564_v49 }
 0x1d7   : > { %660 = vst [vmem:[#allocation3 + $0x8] sm:$0xff] %v658_v51 }
 0x1d8   : > { %659 = vst [vmem:[#allocation3] sm:$0xff] %v657_v53  ;;  %v762_v60 = vld [vmem:[#allocation2] sm:$0xff] (!%p1075_p13) }
 0x1d9   : > { %v763_v61 = vld [vmem:[#allocation2 + $0x8] sm:$0xff] (!%p1075_p13)  ;;  %766 = vst [vmem:[%s2221_s12] sm:$0xff] (!%p1075_p13), %v762_v60 }
 0x1da   : > { %767 = vst [vmem:[%s2221_s12 + $0x8] sm:$0xff] (!%p1075_p13), %v763_v61 }
 0x1dc   : > { %v764_v62 = vld [vmem:[#allocation2 + $0x10] sm:$0xff] (!%p1075_p13) }
 0x1dd   : > { %768 = vst [vmem:[%s2221_s12 + $0x10] sm:$0xff] (!%p1075_p13), %v764_v62  ;;  %v765_v63 = vld [vmem:[#allocation2 + $0x18] sm:$0xff] (!%p1075_p13) }
 0x1de   : > { %v771_v1 = vld [vmem:[#allocation3 + $0x8] sm:$0xff] (!%p1075_p13)  ;;  %769 = vst [vmem:[%s2221_s12 + $0x18] sm:$0xff] (!%p1075_p13), %v765_v63 }
 0x1df   : > { %v770_v0 = vld [vmem:[#allocation3] sm:$0xff] (!%p1075_p13)  ;;  %773 = vst [vmem:[%s2223_s9 + $0x8] sm:$0xff] (!%p1075_p13), %v771_v1 }
 0x1e0   : > { %772 = vst [vmem:[%s2223_s9] sm:$0xff] (!%p1075_p13), %v770_v0 }
 0x1ec   : > { %761 = sbr.rel (%p1075_p13) target bundleno = 507 (0x1fb), region = 60 }
 0x1ee   : > { %v1202_v56 = vpop.f32.mrb[4].mxu0 }
 0x1ef   : > { %v755_v57 = vadd.f32 %v1202_v56, %v662_v54  ;;  %v745_v58 = vpop.f32.mrb[5].mxu0 }
 0x1f0   : > { %v754_v59 = vadd.f32 %v745_v58, %v661_v55 }
 0x1f1   : > { %757 = vst [vmem:[#allocation4 + $0x8] sm:$0xff] %v755_v57 }
 0x1f2   : > { %756 = vst [vmem:[#allocation4] sm:$0xff] %v754_v59 }
 0x1f8   : > { %v775_v3 = vld [vmem:[#allocation4 + $0x8] sm:$0xff] }
 0x1f9   : > { %v774_v2 = vld [vmem:[#allocation4] sm:$0xff]  ;;  %777 = vst [vmem:[%s2225_s19 + $0x8] sm:$0xff] %v775_v3 }
 0x1fa   : > { %776 = vst [vmem:[%s2225_s19] sm:$0xff] %v774_v2 }
 0x1fb PF: > { %s2554_s17 = sld [smem:[#allocation27_spill]]  ;;  %s2556_s11 = sld [smem:[#allocation38_spill]] }
 0x1fc   : > { %s819_s26 = sshll.u32 %s2223_s9, 4  ;;  %s2557_s22 = sld [smem:[#allocation39_spill]]  ;;  %s2319_s26 = int_to_ptr.vmem [resolvable:$true] %s819_s26 }
 0x1fd   : > { %s2328_s14 = scalar_lea.sflag [#allocation15], %s346_s7  ;;  %s1580_s16 = scalar_lea.vmem %s2319_s26, 256 }
 0x1fe   : > { %p1581_p6 = scmp.ne.s32.totalorder %s2319_s26, %s1580_s16  ;;  %p2559_p12 = scmp.ne.s32.totalorder %s2537_s4, 0 }
 0x1ff   : > { %s1806_s13 = smov [#allocation14]  }
 0x200   : > { %p1582_p10 = pnand %p1581_p6, %p2559_p12  ;;  %s1584_s9 = sshll.u32 %s1806_s13, 4  ;;  %s1585_s9 = int_to_ptr.vmem [resolvable:$false] %s1584_s9 }
 0x201   : > { %s1095_s24 = sshll.u32 %s2554_s17, 8  ;;  %s1586_s0 = scalar_lea.vmem %s1585_s9, 512 }
 0x202   : > { %s2316_s25 = scalar_lea.hbm %s2556_s11, %s1095_s24  ;;  %s2558_s5 = smov %s2557_s22 }
 0x203   : > { %s2324_s18 = scalar_lea.hbm %s2557_s22, %s1095_s24  ;;  %p1583_p2 = pneg %p1582_p10 }
 0x204   : > { %p1587_p11 = scmp.lt.s32.totalorder %s2319_s26, %s1585_s9  ;;  %p1588_p7 = scmp.lt.s32.totalorder %s1586_s0, %s1580_s16 }
 0x206   : > { %p1589_p1 = por %p1588_p7, %p1587_p11 }
 0x208   : > { %p1590_p4 = pnand %p1589_p1, %p1583_p2 }
 0x20a   : > { %1593 = shalt.err (!%p1590_p4)
}
 0x20b   : > { %s1594_s7 = scalar_lea.hbm %s2316_s25, 256  ;;  %s1598_s27 = scalar_lea.hbm %s2556_s11, 512 }
 0x20c   : > { %p1595_p0 = scmp.ne.s32.totalorder %s2316_s25, %s1594_s7  ;;  %p1599_p9 = scmp.lt.u32.totalorder %s2316_s25, %s2556_s11 }
 0x20d   : > { %p1600_p5 = scmp.lt.u32.totalorder %s1598_s27, %s1594_s7  ;;  %p1602_p6 = scmp.lt.u32.totalorder %s1594_s7, %s2316_s25 }
 0x20e   : > { %p1596_p3 = pnand %p1595_p0, %p2559_p12 }
 0x20f   : > { %p1601_p13 = por %p1600_p5, %p1599_p9 }
 0x210   : > { %p1597_p8 = pneg %p1596_p3 }
 0x211   : > { %p1603_p10 = por %p1602_p6, %p1601_p13 }
 0x213   : > { %p1604_p2 = pnand %p1603_p10, %p1597_p8 }
 0x215   : > { %1607 = shalt.err (!%p1604_p2)
}
 0x216   : > { %s1807_s16 = smov 128   ;;  %s1808_s13 = smov 8  }
 0x217   : > { %1308 = dma.vmem_to_hbm [thread:$0]  (%p2559_p12), %s2319_s26, 256, %s2316_s25, %s2328_s14, %s1807_s16, %s1807_s16, %s1808_s13  }
 0x218   : > { %s1094_s9 = sshll.u32 %s2554_s17, 9  ;;  %s2560_s15 = sld [smem:[#allocation37_spill]] }
 0x219   : > { %s803_s27 = sshll.u32 %s2221_s12, 4  ;;  %s835_s6 = sshll.u32 %s2225_s19, 4  ;;  %s2362_s27 = int_to_ptr.vmem [resolvable:$true] %s803_s27  ;;  %s2391_s6 = int_to_ptr.vmem [resolvable:$true] %s835_s6 }
 0x21a   : > { %s779_s22 = scalar_lea.sflag [#allocation7], %s2217_s20  ;;  %s1608_s2 = scalar_lea.vmem %s2362_s27, 512 }
 0x21b   : > { %p1609_p11 = scmp.ne.s32.totalorder %s2362_s27, %s1608_s2  ;;  %s1809_s25 = smov [#allocation13]  }
 0x21c   : > { %s1612_s17 = sshll.u32 %s1809_s25, 4  ;;  %s1613_s17 = int_to_ptr.vmem [resolvable:$false] %s1612_s17 }
 0x21d   : > { %p1610_p7 = pnand %p1609_p11, %p2559_p12  ;;  %s1614_s26 = scalar_lea.vmem %s1613_s17, 1024 }
 0x21e   : > { %s2359_s24 = scalar_lea.hbm %s2560_s15, %s1094_s9  ;;  %p1615_p4 = scmp.lt.s32.totalorder %s2362_s27, %s1613_s17 }
 0x21f   : > { %p1611_p1 = pneg %p1610_p7  ;;  %p1616_p0 = scmp.lt.s32.totalorder %s1614_s26, %s1608_s2 }
 0x221   : > { %p1617_p3 = por %p1616_p0, %p1615_p4 }
 0x223   : > { %p1618_p8 = pnand %p1617_p3, %p1611_p1 }
 0x225   : > { %1621 = shalt.err (!%p1618_p8)
}
 0x226   : > { %s1622_s12 = scalar_lea.hbm %s2359_s24, 512  ;;  %s1626_s7 = scalar_lea.hbm %s2560_s15, 1024 }
 0x227   : > { %p1623_p9 = scmp.ne.s32.totalorder %s2359_s24, %s1622_s12  ;;  %p1627_p6 = scmp.lt.u32.totalorder %s2359_s24, %s2560_s15 }
 0x228   : > { %p1628_p10 = scmp.lt.u32.totalorder %s1626_s7, %s1622_s12  ;;  %p1630_p11 = scmp.lt.u32.totalorder %s1622_s12, %s2359_s24 }
 0x229   : > { %p1624_p5 = pnand %p1623_p9, %p2559_p12 }
 0x22a   : > { %p1629_p2 = por %p1628_p10, %p1627_p6 }
 0x22b   : > { %p1625_p13 = pneg %p1624_p5 }
 0x22c   : > { %p1631_p7 = por %p1630_p11, %p1629_p2 }
 0x22e   : > { %p1632_p1 = pnand %p1631_p7, %p1625_p13 }
 0x230   : > { %1635 = shalt.err (!%p1632_p1)
}
 0x231   : > { %s1810_s2 = smov 256   ;;  %s1811_s26 = smov 16  }
 0x232   : > { %1307 = dma.vmem_to_hbm [thread:$0]  (%p2559_p12), %s2362_s27, 512, %s2359_s24, %s779_s22, %s1810_s2, %s1810_s2, %s1811_s26  }
 0x233   : > { %s1636_s12 = scalar_lea.vmem %s2391_s6, 256  ;;  %s1812_s9 = smov [#allocation16]  }
 0x234   : > { %p1637_p4 = scmp.ne.s32.totalorder %s2391_s6, %s1636_s12  ;;  %s1640_s0 = sshll.u32 %s1812_s9, 4  ;;  %s1641_s0 = int_to_ptr.vmem [resolvable:$false] %s1640_s0 }
 0x235   : > { %s1642_s7 = scalar_lea.vmem %s1641_s0, 512  ;;  %p1643_p8 = scmp.lt.s32.totalorder %s2391_s6, %s1641_s0 }
 0x236   : > { %p1638_p0 = pnand %p1637_p4, %p2559_p12  ;;  %p1644_p9 = scmp.lt.s32.totalorder %s1642_s7, %s1636_s12 }
 0x238   : > { %p1639_p3 = pneg %p1638_p0  ;;  %p1645_p5 = por %p1644_p9, %p1643_p8 }
 0x23a   : > { %p1646_p13 = pnand %p1645_p5, %p1639_p3 }
 0x23c   : > { %1649 = shalt.err (!%p1646_p13)
}
 0x23d   : > { %s1650_s20 = scalar_lea.hbm %s2324_s18, 256  ;;  %s1654_s27 = scalar_lea.hbm %s2558_s5, 512 }
 0x23e   : > { %p1651_p6 = scmp.ne.s32.totalorder %s2324_s18, %s1650_s20  ;;  %p1655_p11 = scmp.lt.u32.totalorder %s2324_s18, %s2558_s5 }
 0x23f   : > { %p1656_p7 = scmp.lt.u32.totalorder %s1654_s27, %s1650_s20  ;;  %p1658_p4 = scmp.lt.u32.totalorder %s1650_s20, %s2324_s18 }
 0x240   : > { %p1652_p10 = pnand %p1651_p6, %p2559_p12 }
 0x241   : > { %p1657_p1 = por %p1656_p7, %p1655_p11 }
 0x242   : > { %p1653_p2 = pneg %p1652_p10 }
 0x243   : > { %p1659_p0 = por %p1658_p4, %p1657_p1 }
 0x245   : > { %p1660_p3 = pnand %p1659_p0, %p1653_p2 }
 0x247   : > { %1663 = shalt.err (!%p1660_p3)
}
 0x248   : > { %1309 = dma.vmem_to_hbm [thread:$0]  (%p2559_p12), %s2391_s6, 256, %s2324_s18, %s2328_s14, %s1807_s16, %s1807_s16, %s1808_s13  }
 0x249 PF: > { %s2561_s17 = sld [smem:[#allocation22_spill]]  ;;  %p1337_p8 = scmp.ge.s32.totalorder %s1794_s10, 2 }
 0x24a   : > { %p2562_p9 = scmp.ne.s32.totalorder %s2538_s21, 0 }
 0x24c   : > { %p1327_p5 = pnand %p1337_p8, %p2562_p9 }
 0x24f   : > { %s850_s2 = sand.u32 1, %s2561_s17  }
 0x250   : > { %s851_s26 = scalar_lea.sflag [#allocation7], %s850_s2 }
 0x251   : > { %1733 = dma.done.wait (!%p1327_p5), %s851_s26, 512  }
 0x252   : > { %1735 = vsyncadd (!%p1327_p5), %s851_s26, 4294966784  ;;  %s2563_s4 = sadd.s32 4294967294, %s1794_s10  }
 0x253   : > { %s859_s12 = sand.u32 1, %s2563_s4  }
 0x254   : > { %s860_s9 = scalar_lea.sflag [#allocation15], %s859_s12 }
 0x255   : > { %1737 = dma.done.wait (!%p1327_p5), %s860_s9, 512  }
 0x256   : > { %1739 = vsyncadd (!%p1327_p5), %s860_s9, 4294966784  ;;  %s32_s10 = sadd.s32 1, %s1794_s10   ;;  %s2565_s21 = sld [smem:[#allocation23_spill]] }
 0x257   : > { %p2425_p12 = scmp.ge.s32.totalorder %s32_s10, 6   ;;  %s2566_s24 = sld [smem:[#allocation24_spill]] }
 0x258   : > { %s2567_s25 = sld [smem:[#allocation25_spill]]  ;;  %s2568_s26 = sld [smem:[#allocation32_spill]] }
 0x259   : > { %s2569_s7 = sld [smem:[#allocation28_spill]]  ;;  %s2570_s14 = sld [smem:[#allocation30_spill]] }
 0x25a   : > { %s2571_s9 = sld [smem:[#allocation33_spill]]  ;;  %s2572_s22 = smov %s1750_s23 }
 0x25b   : > { %s2573_s23 = smov %s2054_s30  ;;  %s2574_s27 = smov %s1770_s28 }
 0x25c   : > { %s2575_s28 = smov %s1774_s29  ;;  %s2576_s29 = smov %s2057_s1 }
 0x25d   : > { %s2577_s30 = smov %s1786_s8  ;;  %31 = sbr.rel (!%p2425_p12) target bundleno = 23 (0x17), region = 158 }
 0x25f   : > { %s2578_s8 = smov %s2570_s14 }
 0x264   :  { %874 = vsyncpa [#allocation6], 1 }
 0x265   :  { %876 = vsyncpa [#allocation6 + $0x1], 1 }
 0x266   :  { %877 = vsyncpa [#allocation9], 1 }
 0x267   :  { %879 = vsyncpa [#allocation9 + $0x1], 1 }
 0x268   :  { %880 = vsyncpa [#allocation12], 1 }
 0x269   :  { %882 = vsyncpa [#allocation12 + $0x1], 1 }
 0x26a   :  { %883 = vsyncpa [#allocation7], 1 }
 0x26b   :  { %885 = vsyncpa [#allocation7 + $0x1], 1 }
 0x26c   :  { %886 = vsyncpa [#allocation15], 1 }
 0x26d   :  { %888 = vsyncpa [#allocation15 + $0x1], 1 }

</bundles_post_ra>
